<compile_context>
chip_gen: v6e
topology: v6e:2x2x1
jax: 0.10.0
libtpu: 0.0.40
codegen_flags: <defaults>
</compile_context>

<pallas_src>
import functools

import jax
import jax.numpy as jnp
from jax.experimental import pallas as pl
from jax.experimental.pallas import tpu as pltpu


def _round_up(x, m):
    return ((x + m - 1) // m) * m


def _pad_to(a, shape):
    pads = [(0, s - d) for d, s in zip(a.shape, shape)]
    return jnp.pad(a, pads)


def _default_vmem_limit_bytes():
    try:
        phys = int(pltpu.get_tpu_info().vmem_capacity_bytes)
    except Exception:
        phys = 64 * 1024 * 1024  # conservative (v7x-sized) fallback
    return (phys * 3) // 4  # ~48 MiB on v7x, ~96 MiB on v5e/v6e


def _epilogue_rows(tm):
    if tm <= 256:
        return tm
    for c in (256, 128, 64, 32, 16, 8):
        if tm % c == 0:
            return c
    return tm


def _choose_tiles(batch, repr_dim, n_enc, f_pad, out_pad, obs_itemsize, wt_itemsize,
                  small_bytes, tm_target, tk_target, vmem_limit):
    """Pick (tm, tk, wt_resident) that fits the VMEM budget (conservative: 2x buffers)."""
    budget = vmem_limit - small_bytes - (2 << 20)  # slack for compiler scratch

    def fits(tm, tk, resident):
        k_pad = _round_up(repr_dim, tk)
        if resident:
            wt_b = 2 * n_enc * k_pad * f_pad * wt_itemsize   # assume double-buffered
        else:
            wt_b = 2 * n_enc * tk * f_pad * wt_itemsize      # streamed K tile, 2 buffers
        obs_b = 2 * n_enc * tm * tk * obs_itemsize           # obs double buffer
        misc = tm * f_pad * 4 + 2 * tm * out_pad * 4         # acc scratch + out buffers
        return wt_b + obs_b + misc <= budget

    tk0 = repr_dim if repr_dim <= tk_target else tk_target   # full-dim block is always legal
    tm0 = batch if batch <= tm_target else tm_target

    for resident in (True, False):
        tm, tk = tm0, tk0
        while not fits(tm, tk, resident) and tk > 128:
            tk = max(128, (tk // 2) // 128 * 128)
        while not fits(tm, tk, resident) and tm > 8:
            tm = max(8, ((tm // 2) + 7) // 8 * 8)
        if fits(tm, tk, resident):
            return tm, tk, resident
    # Last resort: smallest tiles, streamed weight (weight re-streams across batch tiles).
    return tm, tk, False


def _actor_kernel(
    obs_ref,    # (n_enc, TM, TK)                 obs tile (incoming dtype)
    wt_ref,     # resident: (n_enc, K_pad, F_pad) | streamed: (n_enc, TK, F_pad)
    vecs_ref,   # (6, W)   f32 packed [bt, gamma, beta, b1, b2, b3] (zero padded)
    w1_ref,     # (F_pad, H_pad)  f32 resident
    w2_ref,     # (H_pad, H_pad)  f32 resident
    w3_ref,     # (H_pad, OUT_pad) f32 resident
    out_ref,    # (TM, OUT_pad)   f32  [mean | std | pad]
    acc_ref,    # (TM, F_pad)     f32 VMEM scratch accumulator
    *,
    n_enc, feature_dim, f_pad, h_pad, action_dim, out_pad,
    min_log_std, log_std_range, tk, k_rem, num_k_tiles, wt_resident, tm, epi_rows,
):
    k = pl.program_id(1)

    @pl.when(k == 0)
    def _():
        acc_ref[...] = jnp.zeros_like(acc_ref)

    # --- trunk matmul contribution for this K tile, summed over encoders ---
    # x @ W_trunk == sum_e obs[e] @ wt[e]  (process_obs concatenates encoders on features).
    mxu_dtype = wt_ref.dtype
    acc = acc_ref[...]
    for e in range(n_enc):
        x_e = obs_ref[e].astype(mxu_dtype)
        if k_rem:  # ragged last K tile: zero the tail columns (obs is NOT padded in HBM)
            limit = jnp.where(k == num_k_tiles - 1, k_rem, tk)
            col = jax.lax.broadcasted_iota(jnp.int32, x_e.shape, 1)
            x_e = jnp.where(col < limit, x_e, jnp.zeros((), mxu_dtype))
        if wt_resident and num_k_tiles > 1:
            koff = pl.multiple_of(k * tk, tk)
            w_e = wt_ref[e, pl.ds(koff, tk), :]     # slice resident weight (no re-DMA)
        else:
            w_e = wt_ref[e]
        acc = acc + jnp.dot(x_e, w_e, preferred_element_type=jnp.float32)
    acc_ref[...] = acc

    @pl.when(k == pl.num_programs(1) - 1)
    def _():
        bt = vecs_ref[0:1, 0:f_pad]
        gamma = vecs_ref[1:2, 0:f_pad]
        beta = vecs_ref[2:3, 0:f_pad]
        b1 = vecs_ref[3:4, 0:h_pad]
        b2 = vecs_ref[4:5, 0:h_pad]
        b3 = vecs_ref[5:6, 0:out_pad]
        inv_f = 1.0 / float(feature_dim)

        def finish(row0):
            # --- trunk: (Linear done) -> LayerNorm over TRUE feature_dim -> Tanh ---
            h = acc_ref[pl.ds(row0, epi_rows), :] + bt       # padded cols are exactly 0
            mu = jnp.sum(h, axis=-1, keepdims=True) * inv_f
            hm = h - mu
            if f_pad != feature_dim:
                colf = jax.lax.broadcasted_iota(jnp.int32, hm.shape, 1)
                hm = jnp.where(colf < feature_dim, hm, 0.0)
            var = jnp.sum(hm * hm, axis=-1, keepdims=True) * inv_f
            h = (h - mu) * jax.lax.rsqrt(var + 1e-5)         # PyTorch LayerNorm eps=1e-5
            h = h * gamma + beta                             # padded cols -> 0
            h = jnp.tanh(h)
            # --- policy MLP (tiny, kept f32) ---
            h = jnp.maximum(jnp.dot(h, w1_ref[...], preferred_element_type=jnp.float32) + b1, 0.0)
            h = jnp.maximum(jnp.dot(h, w2_ref[...], preferred_element_type=jnp.float32) + b2, 0.0)
            o = jnp.dot(h, w3_ref[...], preferred_element_type=jnp.float32) + b3
            # --- TruncStochasticActor.mean_std head, fused lane-dense slab ---
            t = jnp.tanh(o)
            std = jnp.exp((t + 1.0) * (0.5 * log_std_range) + min_log_std)
            colo = jax.lax.broadcasted_iota(jnp.int32, t.shape, 1)
            out_ref[pl.ds(row0, epi_rows), :] = jnp.where(colo < action_dim, t, std)

        n_chunks = tm // epi_rows
        if n_chunks == 1:
            finish(0)
        else:
            def body(c, carry):
                finish(pl.multiple_of(c * epi_rows, epi_rows))
                return carry
            jax.lax.fori_loop(0, n_chunks, body, 0, unroll=True)


def prepare_params(params, obs_shape, *, min_log_std, max_log_std,
                   obs_dtype=jnp.float32, trunk_dtype=jnp.bfloat16,
                   tm_target=256, tk_target=1024, vmem_limit_bytes=None):
    """One-time parameter packing + tile selection (hoisted out of the per-call path)."""
    n_enc, batch, repr_dim = (int(s) for s in obs_shape)
    wt, bt, g, be, w1, b1, w2, b2, w3, b3 = params
    in_dim, feat = wt.shape
    assert in_dim == n_enc * repr_dim, "trunk weight in_dim must equal n_enc*repr_dim"
    hid = w1.shape[1]
    two_a = w3.shape[1]
    action_dim = two_a // 2
    # prepare_params owns ALL padding: incoming params must be the unpadded module params.
    assert bt.size == feat and g.size == feat and be.size == feat
    assert b1.size == hid and b2.size == hid and b3.size == two_a

    f_pad = _round_up(max(feat, 128), 128)
    h_pad = _round_up(max(hid, 128), 128)
    out_pad = _round_up(max(two_a, 128), 128)
    w_vec = max(f_pad, h_pad, out_pad)

    vmem_limit = int(vmem_limit_bytes or _default_vmem_limit_bytes())
    small_bytes = 2 * (6 * w_vec + f_pad * h_pad + h_pad * h_pad + h_pad * out_pad) * 4
    tm, tk, wt_resident = _choose_tiles(
        batch, repr_dim, n_enc, f_pad, out_pad,
        jnp.dtype(obs_dtype).itemsize, jnp.dtype(trunk_dtype).itemsize,
        small_bytes, tm_target, tk_target, vmem_limit)
    k_pad = _round_up(repr_dim, tk)

    # Trunk weight: per-encoder view, zero-padded (pads MUST be zero for the unmasked
    # LayerNorm mean and the masked K-tail to be correct), cast once for the MXU.
    wt3 = _pad_to(wt.reshape(n_enc, repr_dim, feat), (n_enc, k_pad, f_pad)).astype(trunk_dtype)
    w1p = _pad_to(w1.astype(jnp.float32), (f_pad, h_pad))
    w2p = _pad_to(w2.astype(jnp.float32), (h_pad, h_pad))
    w3p = _pad_to(w3.astype(jnp.float32), (h_pad, out_pad))

    def _row(v):
        return _pad_to(v.reshape(1, -1).astype(jnp.float32), (1, w_vec))

    vecs = jnp.concatenate([_row(bt), _row(g), _row(be), _row(b1), _row(b2), _row(b3)], axis=0)

    cfg = dict(
        n_enc=n_enc, batch=batch, repr_dim=repr_dim,
        feature_dim=int(feat), action_dim=int(action_dim), two_a=int(two_a),
        f_pad=f_pad, h_pad=h_pad, out_pad=out_pad, w_vec=w_vec,
        tm=tm, tk=tk, k_pad=k_pad, wt_resident=wt_resident,
        min_log_std=float(min_log_std),
        log_std_range=float(max_log_std) - float(min_log_std),
        vmem_limit=vmem_limit,
    )
    return (wt3, vecs, w1p, w2p, w3p), cfg


def trunc_stochastic_actor_forward(obs, prepared):
    """obs: (num_encoders, batch, repr_dim) — ParallelEncoder output, read once from HBM."""
    (wt3, vecs, w1p, w2p, w3p), cfg = prepared
    n_enc, batch, repr_dim = obs.shape
    assert (n_enc, batch, repr_dim) == (cfg["n_enc"], cfg["batch"], cfg["repr_dim"])

    tm, tk = cfg["tm"], cfg["tk"]
    f_pad, h_pad, out_pad = cfg["f_pad"], cfg["h_pad"], cfg["out_pad"]
    b_tiles = pl.cdiv(batch, tm)
    k_tiles = pl.cdiv(repr_dim, tk)
    b_pad = b_tiles * tm
    k_rem = (repr_dim % tk) if k_tiles > 1 else 0

    kernel = functools.partial(
        _actor_kernel,
        n_enc=n_enc, feature_dim=cfg["feature_dim"], f_pad=f_pad, h_pad=h_pad,
        action_dim=cfg["action_dim"], out_pad=out_pad,
        min_log_std=cfg["min_log_std"], log_std_range=cfg["log_std_range"],
        tk=tk, k_rem=k_rem, num_k_tiles=k_tiles, wt_resident=cfg["wt_resident"],
        tm=tm, epi_rows=_epilogue_rows(tm),
    )

    if cfg["wt_resident"]:
        # Constant block index -> trunk weight DMA'd into VMEM once for the whole grid.
        wt_spec = pl.BlockSpec((n_enc, cfg["k_pad"], f_pad), lambda i, k: (0, 0, 0))
    else:
        # Fallback: streamed per K tile (note: re-streams once per batch tile).
        wt_spec = pl.BlockSpec((n_enc, tk, f_pad), lambda i, k: (0, k, 0))

    grid_spec = pltpu.PrefetchScalarGridSpec(
        num_scalar_prefetch=0,
        grid=(b_tiles, k_tiles),
        in_specs=[
            pl.BlockSpec((n_enc, tm, tk), lambda i, k: (0, i, k)),   # obs tile (no pad copy)
            wt_spec,                                                 # trunk weight
            pl.BlockSpec((6, cfg["w_vec"]), lambda i, k: (0, 0)),    # packed bias/LN vectors
            pl.BlockSpec((f_pad, h_pad), lambda i, k: (0, 0)),       # w1 (resident)
            pl.BlockSpec((h_pad, h_pad), lambda i, k: (0, 0)),       # w2 (resident)
            pl.BlockSpec((h_pad, out_pad), lambda i, k: (0, 0)),     # w3 (resident)
        ],
        out_specs=pl.BlockSpec((tm, out_pad), lambda i, k: (i, 0)),
        scratch_shapes=[pltpu.VMEM((tm, f_pad), jnp.float32)],
    )

    out = pl.pallas_call(
        kernel,
        grid_spec=grid_spec,
        out_shape=jax.ShapeDtypeStruct((b_pad, out_pad), jnp.float32),
        compiler_params=pltpu.CompilerParams(
            dimension_semantics=("parallel", "arbitrary"),
            vmem_limit_bytes=cfg["vmem_limit"],
        ),
    )(obs, wt3, vecs, w1p, w2p, w3p)

    a = cfg["action_dim"]
    mean = out[:batch, :a]
    std = out[:batch, a:cfg["two_a"]]
    return mean, std


def init_params(key, in_dim, feature_dim, hidden_dim, action_dim):
    """Deterministic synthetic parameters (shapes match the nn.Module)."""
    ks = jax.random.split(key, 8)
    scale = 0.05
    wt = scale * jax.random.normal(ks[0], (in_dim, feature_dim), jnp.float32)
    bt = jnp.zeros((1, feature_dim), jnp.float32)
    g = jnp.ones((1, feature_dim), jnp.float32)        # LayerNorm gamma
    be = jnp.zeros((1, feature_dim), jnp.float32)      # LayerNorm beta
    w1 = scale * jax.random.normal(ks[1], (feature_dim, hidden_dim), jnp.float32)
    b1 = 0.01 * jax.random.normal(ks[2], (1, hidden_dim), jnp.float32)
    w2 = scale * jax.random.normal(ks[3], (hidden_dim, hidden_dim), jnp.float32)
    b2 = 0.01 * jax.random.normal(ks[4], (1, hidden_dim), jnp.float32)
    w3 = scale * jax.random.normal(ks[5], (hidden_dim, 2 * action_dim), jnp.float32)
    b3 = 0.01 * jax.random.normal(ks[6], (1, 2 * action_dim), jnp.float32)
    return (wt, bt, g, be, w1, b1, w2, b2, w3, b3)


def _reference(obs, params, *, min_log_std, max_log_std):
    """Pure-JAX f32 reference of TruncStochasticActor.mean_std."""
    n_enc, batch, repr_dim = obs.shape
    x = jnp.transpose(obs, (1, 0, 2)).reshape(batch, n_enc * repr_dim)
    wt, bt, g, be, w1, b1, w2, b2, w3, b3 = params
    h = x @ wt + bt
    mu = jnp.mean(h, axis=-1, keepdims=True)
    var = jnp.mean((h - mu) ** 2, axis=-1, keepdims=True)
    h = (h - mu) / jnp.sqrt(var + 1e-5) * g + be
    h = jnp.tanh(h)
    h = jnp.maximum(h @ w1 + b1, 0.0)
    h = jnp.maximum(h @ w2 + b2, 0.0)
    out = jnp.tanh(h @ w3 + b3)
    a = w3.shape[1] // 2
    mean, log_std = out[:, :a], out[:, a:]
    log_std = (log_std + 1.0) / 2.0 * (max_log_std - min_log_std) + min_log_std
    return mean, jnp.exp(log_std)


if __name__ == "__main__":
    # Small synthetic shapes consistent with the module:
    #   num_encoders=2, batch=4, repr_dim (per encoder)=128,
    #   feature_dim=32, hidden_dim=32, action_dim=4, min_log_std=-10, max_log_std=2
    n_encoders, batch, repr_dim = 2, 4, 128
    feature_dim, hidden_dim, action_dim = 32, 32, 4
    min_log_std, max_log_std = -10.0, 2.0

    key = jax.random.PRNGKey(0)
    k_obs, k_par = jax.random.split(key)
    obs = jax.random.normal(k_obs, (n_encoders, batch, repr_dim), jnp.float32)
    params = init_params(
        k_par, n_encoders * repr_dim, feature_dim, hidden_dim, action_dim
    )

    # One-time parameter packing (hoisted out of the per-step path).
    prepared = prepare_params(
        params, obs.shape, min_log_std=min_log_std, max_log_std=max_log_std,
        obs_dtype=obs.dtype,
    )

    mean, std = trunc_stochastic_actor_forward(obs, prepared)
    jax.block_until_ready((mean, std))

    ref_mean, ref_std = _reference(
        obs, params, min_log_std=min_log_std, max_log_std=max_log_std
    )
    # bf16 trunk matmul (obs + weight quantized to bf16 on the MXU) -> relaxed tolerance.
    assert jnp.allclose(mean, ref_mean, atol=1e-2, rtol=1e-2), "mean mismatch"
    assert jnp.allclose(std, ref_std, atol=1e-2, rtol=1e-2), "std mismatch"

    print("KERNEL_OK")
</pallas_src>

<mosaic_0001>
module attributes {stable_mosaic.version = 11 : i64} {
  func.func @_actor_kernel(%arg0: i32, %arg1: i32, %arg2: memref<2x4x128xf32, #tpu.memory_space<vmem>>, %arg3: memref<2x128x128xbf16, #tpu.memory_space<vmem>>, %arg4: memref<6x128xf32, #tpu.memory_space<vmem>>, %arg5: memref<128x128xf32, #tpu.memory_space<vmem>>, %arg6: memref<128x128xf32, #tpu.memory_space<vmem>>, %arg7: memref<128x128xf32, #tpu.memory_space<vmem>>, %arg8: memref<4x128xf32, #tpu.memory_space<vmem>>, %arg9: memref<4x128xf32, #tpu.memory_space<vmem>>) attributes {dimension_semantics = [#tpu.dimension_semantics<parallel>, #tpu.dimension_semantics<arbitrary>], iteration_bounds = array<i64: 1, 1>, scalar_prefetch = 0 : i64, scratch_operands = 1 : i64, tpu.core_type = #tpu.core_type<tc>, window_params = [{transform_indices = @transform_0, window_bounds = array<i64: 2, 4, 128>}, {pipeline_mode = #tpu.pipeline_mode<synchronous>, transform_indices = @transform_1, window_bounds = array<i64: 2, 128, 128>}, {pipeline_mode = #tpu.pipeline_mode<synchronous>, transform_indices = @transform_2, window_bounds = array<i64: 6, 128>}, {pipeline_mode = #tpu.pipeline_mode<synchronous>, transform_indices = @transform_3, window_bounds = array<i64: 128, 128>}, {pipeline_mode = #tpu.pipeline_mode<synchronous>, transform_indices = @transform_4, window_bounds = array<i64: 128, 128>}, {pipeline_mode = #tpu.pipeline_mode<synchronous>, transform_indices = @transform_5, window_bounds = array<i64: 128, 128>}, {transform_indices = @transform_6, window_bounds = array<i64: 4, 128>}]} {
    %c0_i32 = arith.constant 0 : i32
    %0 = arith.cmpi eq, %arg1, %c0_i32 : i32
    %1 = arith.extui %0 : i1 to i32
    %c0_i32_0 = arith.constant 0 : i32
    %2 = arith.cmpi ne, %1, %c0_i32_0 : i32
    scf.if %2 {
      %cst_18 = arith.constant 0.000000e+00 : f32
      %22 = vector.broadcast %cst_18 : f32 to vector<4x128xf32>
      %c0_19 = arith.constant 0 : index
      %c0_20 = arith.constant 0 : index
      %23 = vector.load %arg9[%c0_19, %c0_20] : memref<4x128xf32, #tpu.memory_space<vmem>>, vector<4x128xf32>
      tpu.vector_store %arg9[%c0_19, %c0_20], %22 {strides = array<i32>} : memref<4x128xf32, #tpu.memory_space<vmem>>, vector<4x128xf32>,
    } else {
    }
    %c0 = arith.constant 0 : index
    %c0_1 = arith.constant 0 : index
    %3 = vector.load %arg9[%c0, %c0_1] : memref<4x128xf32, #tpu.memory_space<vmem>>, vector<4x128xf32>
    %c0_2 = arith.constant 0 : index
    %c0_3 = arith.constant 0 : index
    %c0_4 = arith.constant 0 : index
    %4 = vector.load %arg2[%c0_2, %c0_3, %c0_4] : memref<2x4x128xf32, #tpu.memory_space<vmem>>, vector<1x4x128xf32>
    %5 = vector.shape_cast %4 : vector<1x4x128xf32> to vector<4x128xf32>
    %6 = arith.truncf %5 : vector<4x128xf32> to vector<4x128xbf16>
    %c0_5 = arith.constant 0 : index
    %c0_6 = arith.constant 0 : index
    %c0_7 = arith.constant 0 : index
    %7 = vector.load %arg3[%c0_5, %c0_6, %c0_7] : memref<2x128x128xbf16, #tpu.memory_space<vmem>>, vector<1x128x128xbf16>
    %8 = vector.shape_cast %7 : vector<1x128x128xbf16> to vector<128x128xbf16>
    %cst = arith.constant dense<0.000000e+00> : vector<4x128xf32>
    %9 = tpu.matmul %6, %8, %cst {dimension_numbers = #tpu.dot_dimension_numbers<[1], [0], [0], [1], [0, 0, 1, 1], [], []>} : vector<4x128xbf16>, vector<128x128xbf16>, vector<4x128xf32> -> vector<4x128xf32>
    %10 = arith.addf %3, %9 : vector<4x128xf32>
    %c1 = arith.constant 1 : index
    %c0_8 = arith.constant 0 : index
    %c0_9 = arith.constant 0 : index
    %11 = vector.load %arg2[%c1, %c0_8, %c0_9] : memref<2x4x128xf32, #tpu.memory_space<vmem>>, vector<1x4x128xf32>
    %12 = vector.shape_cast %11 : vector<1x4x128xf32> to vector<4x128xf32>
    %13 = arith.truncf %12 : vector<4x128xf32> to vector<4x128xbf16>
    %c1_10 = arith.constant 1 : index
    %c0_11 = arith.constant 0 : index
    %c0_12 = arith.constant 0 : index
    %14 = vector.load %arg3[%c1_10, %c0_11, %c0_12] : memref<2x128x128xbf16, #tpu.memory_space<vmem>>, vector<1x128x128xbf16>
    %15 = vector.shape_cast %14 : vector<1x128x128xbf16> to vector<128x128xbf16>
    %cst_13 = arith.constant dense<0.000000e+00> : vector<4x128xf32>
    %16 = tpu.matmul %13, %15, %cst_13 {dimension_numbers = #tpu.dot_dimension_numbers<[1], [0], [0], [1], [0, 0, 1, 1], [], []>} : vector<4x128xbf16>, vector<128x128xbf16>, vector<4x128xf32> -> vector<4x128xf32>
    %17 = arith.addf %10, %16 : vector<4x128xf32>
    %c0_14 = arith.constant 0 : index
    %c0_15 = arith.constant 0 : index
    %18 = vector.load %arg9[%c0_14, %c0_15] : memref<4x128xf32, #tpu.memory_space<vmem>>, vector<4x128xf32>
    tpu.vector_store %arg9[%c0_14, %c0_15], %17 {strides = array<i32>} : memref<4x128xf32, #tpu.memory_space<vmem>>, vector<4x128xf32>,
    %c0_i32_16 = arith.constant 0 : i32
    %19 = arith.cmpi eq, %arg1, %c0_i32_16 : i32
    %20 = arith.extui %19 : i1 to i32
    %c0_i32_17 = arith.constant 0 : i32
    %21 = arith.cmpi ne, %20, %c0_i32_17 : i32
    scf.if %21 {
      %c0_18 = arith.constant 0 : index
      %c0_19 = arith.constant 0 : index
      %22 = vector.load %arg4[%c0_18, %c0_19] : memref<6x128xf32, #tpu.memory_space<vmem>>, vector<1x128xf32>
      %c1_20 = arith.constant 1 : index
      %c0_21 = arith.constant 0 : index
      %23 = vector.load %arg4[%c1_20, %c0_21] : memref<6x128xf32, #tpu.memory_space<vmem>>, vector<1x128xf32>
      %c2 = arith.constant 2 : index
      %c0_22 = arith.constant 0 : index
      %24 = vector.load %arg4[%c2, %c0_22] : memref<6x128xf32, #tpu.memory_space<vmem>>, vector<1x128xf32>
      %c3 = arith.constant 3 : index
      %c0_23 = arith.constant 0 : index
      %25 = vector.load %arg4[%c3, %c0_23] : memref<6x128xf32, #tpu.memory_space<vmem>>, vector<1x128xf32>
      %c4 = arith.constant 4 : index
      %c0_24 = arith.constant 0 : index
      %26 = vector.load %arg4[%c4, %c0_24] : memref<6x128xf32, #tpu.memory_space<vmem>>, vector<1x128xf32>
      %c5 = arith.constant 5 : index
      %c0_25 = arith.constant 0 : index
      %27 = vector.load %arg4[%c5, %c0_25] : memref<6x128xf32, #tpu.memory_space<vmem>>, vector<1x128xf32>
      %c0_26 = arith.constant 0 : index
      %c0_27 = arith.constant 0 : index
      %28 = vector.load %arg9[%c0_26, %c0_27] : memref<4x128xf32, #tpu.memory_space<vmem>>, vector<4x128xf32>
      %29 = vector.broadcast %22 : vector<1x128xf32> to vector<4x128xf32>
      %30 = arith.addf %28, %29 : vector<4x128xf32>
      %cst_28 = arith.constant dense<0.000000e+00> : vector<4xf32>
      %31 = vector.multi_reduction <add>, %30, %cst_28 [1] : vector<4x128xf32> to vector<4xf32>
      %32 = vector.shape_cast %31 : vector<4xf32> to vector<4x1xf32>
      %cst_29 = arith.constant 3.125000e-02 : f32
      %33 = vector.broadcast %cst_29 : f32 to vector<4x1xf32>
      %34 = arith.mulf %32, %33 : vector<4x1xf32>
      %35 = vector.broadcast %34 : vector<4x1xf32> to vector<4x128xf32>
      %36 = arith.subf %30, %35 : vector<4x128xf32>
      %37 = tpu.iota {dimensions = array<i32: 1>} : vector<4x128xi32>
      %c32_i32 = arith.constant 32 : i32
      %38 = vector.broadcast %c32_i32 : i32 to vector<4x128xi32>
      %39 = arith.cmpi slt, %37, %38 : vector<4x128xi32>
      %cst_30 = arith.constant 0.000000e+00 : f32
      %40 = vector.broadcast %cst_30 : f32 to vector<4x128xf32>
      %41 = arith.select %39, %36, %40 : vector<4x128xi1>, vector<4x128xf32>
      %42 = arith.mulf %41, %41 : vector<4x128xf32>
      %cst_31 = arith.constant dense<0.000000e+00> : vector<4xf32>
      %43 = vector.multi_reduction <add>, %42, %cst_31 [1] : vector<4x128xf32> to vector<4xf32>
      %44 = vector.shape_cast %43 : vector<4xf32> to vector<4x1xf32>
      %cst_32 = arith.constant 3.125000e-02 : f32
      %45 = vector.broadcast %cst_32 : f32 to vector<4x1xf32>
      %46 = arith.mulf %44, %45 : vector<4x1xf32>
      %47 = vector.broadcast %34 : vector<4x1xf32> to vector<4x128xf32>
      %48 = arith.subf %30, %47 : vector<4x128xf32>
      %cst_33 = arith.constant 9.99999974E-6 : f32
      %49 = vector.broadcast %cst_33 : f32 to vector<4x1xf32>
      %50 = arith.addf %46, %49 : vector<4x1xf32>
      %51 = math.rsqrt %50 : vector<4x1xf32>
      %52 = vector.broadcast %51 : vector<4x1xf32> to vector<4x128xf32>
      %53 = arith.mulf %48, %52 : vector<4x128xf32>
      %54 = vector.broadcast %23 : vector<1x128xf32> to vector<4x128xf32>
      %55 = arith.mulf %53, %54 : vector<4x128xf32>
      %56 = vector.broadcast %24 : vector<1x128xf32> to vector<4x128xf32>
      %57 = arith.addf %55, %56 : vector<4x128xf32>
      %58 = math.tanh %57 : vector<4x128xf32>
      %c0_34 = arith.constant 0 : index
      %c0_35 = arith.constant 0 : index
      %59 = vector.load %arg5[%c0_34, %c0_35] : memref<128x128xf32, #tpu.memory_space<vmem>>, vector<128x128xf32>
      %cst_36 = arith.constant dense<0.000000e+00> : vector<4x128xf32>
      %60 = tpu.matmul %58, %59, %cst_36 {dimension_numbers = #tpu.dot_dimension_numbers<[1], [0], [0], [1], [0, 0, 1, 1], [], []>} : vector<4x128xf32>, vector<128x128xf32>, vector<4x128xf32> -> vector<4x128xf32>
      %61 = vector.broadcast %25 : vector<1x128xf32> to vector<4x128xf32>
      %62 = arith.addf %60, %61 : vector<4x128xf32>
      %cst_37 = arith.constant 0.000000e+00 : f32
      %63 = vector.broadcast %cst_37 : f32 to vector<4x128xf32>
      %64 = arith.maximumf %62, %63 : vector<4x128xf32>
      %c0_38 = arith.constant 0 : index
      %c0_39 = arith.constant 0 : index
      %65 = vector.load %arg6[%c0_38, %c0_39] : memref<128x128xf32, #tpu.memory_space<vmem>>, vector<128x128xf32>
      %cst_40 = arith.constant dense<0.000000e+00> : vector<4x128xf32>
      %66 = tpu.matmul %64, %65, %cst_40 {dimension_numbers = #tpu.dot_dimension_numbers<[1], [0], [0], [1], [0, 0, 1, 1], [], []>} : vector<4x128xf32>, vector<128x128xf32>, vector<4x128xf32> -> vector<4x128xf32>
      %67 = vector.broadcast %26 : vector<1x128xf32> to vector<4x128xf32>
      %68 = arith.addf %66, %67 : vector<4x128xf32>
      %cst_41 = arith.constant 0.000000e+00 : f32
      %69 = vector.broadcast %cst_41 : f32 to vector<4x128xf32>
      %70 = arith.maximumf %68, %69 : vector<4x128xf32>
      %c0_42 = arith.constant 0 : index
      %c0_43 = arith.constant 0 : index
      %71 = vector.load %arg7[%c0_42, %c0_43] : memref<128x128xf32, #tpu.memory_space<vmem>>, vector<128x128xf32>
      %cst_44 = arith.constant dense<0.000000e+00> : vector<4x128xf32>
      %72 = tpu.matmul %70, %71, %cst_44 {dimension_numbers = #tpu.dot_dimension_numbers<[1], [0], [0], [1], [0, 0, 1, 1], [], []>} : vector<4x128xf32>, vector<128x128xf32>, vector<4x128xf32> -> vector<4x128xf32>
      %73 = vector.broadcast %27 : vector<1x128xf32> to vector<4x128xf32>
      %74 = arith.addf %72, %73 : vector<4x128xf32>
      %75 = math.tanh %74 : vector<4x128xf32>
      %cst_45 = arith.constant 1.000000e+00 : f32
      %76 = vector.broadcast %cst_45 : f32 to vector<4x128xf32>
      %77 = arith.addf %75, %76 : vector<4x128xf32>
      %cst_46 = arith.constant 6.000000e+00 : f32
      %78 = vector.broadcast %cst_46 : f32 to vector<4x128xf32>
      %79 = arith.mulf %77, %78 : vector<4x128xf32>
      %cst_47 = arith.constant -1.000000e+01 : f32
      %80 = vector.broadcast %cst_47 : f32 to vector<4x128xf32>
      %81 = arith.addf %79, %80 : vector<4x128xf32>
      %82 = math.exp %81 : vector<4x128xf32>
      %83 = tpu.iota {dimensions = array<i32: 1>} : vector<4x128xi32>
      %c4_i32 = arith.constant 4 : i32
      %84 = vector.broadcast %c4_i32 : i32 to vector<4x128xi32>
      %85 = arith.cmpi slt, %83, %84 : vector<4x128xi32>
      %86 = arith.select %85, %75, %82 : vector<4x128xi1>, vector<4x128xf32>
      %c0_48 = arith.constant 0 : index
      %c0_49 = arith.constant 0 : index
      %87 = vector.load %arg8[%c0_48, %c0_49] : memref<4x128xf32, #tpu.memory_space<vmem>>, vector<4x128xf32>
      tpu.vector_store %arg8[%c0_48, %c0_49], %86 {strides = array<i32>} : memref<4x128xf32, #tpu.memory_space<vmem>>, vector<4x128xf32>,
    } else {
    }
    return
  }
  func.func @transform_0(%arg0: i32, %arg1: i32) -> (i32, i32, i32) {
    %c0_i32 = arith.constant 0 : i32
    %c0_i32_0 = arith.constant 0 : i32
    return %c0_i32, %arg0, %arg1 : i32, i32, i32
  }
  func.func @transform_1(%arg0: i32, %arg1: i32) -> (i32, i32, i32) {
    %c0_i32 = arith.constant 0 : i32
    %c0_i32_0 = arith.constant 0 : i32
    %c0_i32_1 = arith.constant 0 : i32
    %c0_i32_2 = arith.constant 0 : i32
    return %c0_i32, %c0_i32_0, %c0_i32_1 : i32, i32, i32
  }
  func.func @transform_2(%arg0: i32, %arg1: i32) -> (i32, i32) {
    %c0_i32 = arith.constant 0 : i32
    %c0_i32_0 = arith.constant 0 : i32
    %c0_i32_1 = arith.constant 0 : i32
    return %c0_i32, %c0_i32_0 : i32, i32
  }
  func.func @transform_3(%arg0: i32, %arg1: i32) -> (i32, i32) {
    %c0_i32 = arith.constant 0 : i32
    %c0_i32_0 = arith.constant 0 : i32
    %c0_i32_1 = arith.constant 0 : i32
    return %c0_i32, %c0_i32_0 : i32, i32
  }
  func.func @transform_4(%arg0: i32, %arg1: i32) -> (i32, i32) {
    %c0_i32 = arith.constant 0 : i32
    %c0_i32_0 = arith.constant 0 : i32
    %c0_i32_1 = arith.constant 0 : i32
    return %c0_i32, %c0_i32_0 : i32, i32
  }
  func.func @transform_5(%arg0: i32, %arg1: i32) -> (i32, i32) {
    %c0_i32 = arith.constant 0 : i32
    %c0_i32_0 = arith.constant 0 : i32
    %c0_i32_1 = arith.constant 0 : i32
    return %c0_i32, %c0_i32_0 : i32, i32
  }
  func.func @transform_6(%arg0: i32, %arg1: i32) -> (i32, i32) {
    %c0_i32 = arith.constant 0 : i32
    %c0_i32_0 = arith.constant 0 : i32
    return %arg0, %c0_i32 : i32, i32
  }
}

</mosaic_0001>

<bundles_post_ra>
// kernel: tpu_custom_call.1
= control target key start
LH: loop header
LB: loop body
LE: loop exit
PB: predicated region body
PF: predicated region fallthrough
CT: control target
= control target key end

     0   :  { %11 = vsyncpa [#allocation4], 0  ;;  %s1255_s0 = inlined_call_operand.hbm [shape: f32[2,4,128], index: 0, kind: input, shape index: {}]   ;;  %s1256_s1 = inlined_call_operand.hbm [shape: bf16[2,128,128], index: 1, kind: input, shape index: {}]   ;;  %s1257_s2 = inlined_call_operand.hbm [shape: f32[6,128], index: 2, kind: input, shape index: {}]   ;;  %s1258_s3 = inlined_call_operand.hbm [shape: f32[128,128], index: 3, kind: input, shape index: {}]   ;;  %s1259_s4 = inlined_call_operand.hbm [shape: f32[128,128], index: 4, kind: input, shape index: {}]   ;;  %s1260_s5 = inlined_call_operand.hbm [shape: f32[128,128], index: 5, kind: input, shape index: {}]   ;;  %s1261_s6 = inlined_call_operand.hbm [shape: f32[4,128], index: 6, kind: output, shape index: {}]  }
   0x1   :  { %12 = vsyncpa [#allocation7], 0 }
   0x2   :  { %13 = vsyncpa [#allocation10], 0 }
   0x3   :  { %14 = vsyncpa [#allocation13], 0 }
   0x4   :  { %15 = vsyncpa [#allocation5], 0  ;;  %s1094_s21 = smov [#allocation6]   ;;  %s1095_s23 = smov [#allocation9]  }
   0x5   :  { %s33_s22 = sshll.u32 %s1094_s21, 4  ;;  %s55_s24 = sshll.u32 %s1095_s23, 4  ;;  %s34_s22 = int_to_ptr.vmem [resolvable:$true] %s33_s22  ;;  %s56_s24 = int_to_ptr.vmem [resolvable:$true] %s55_s24 }
   0x6   :  { %s952_s25 = scalar_lea.vmem %s34_s22, 2048  ;;  %p957_p1 = scmp.lt.s32.totalorder %s34_s22, %s34_s22 }
   0x7   :  { %p953_p0 = scmp.ne.s32.totalorder %s34_s22, %s952_s25  ;;  %p958_p2 = scmp.lt.s32.totalorder %s952_s25, %s952_s25 }
   0x9   :  { %p959_p3 = por %p958_p2, %p957_p1 }
   0xb   :  { %p960_p4 = pnand %p959_p3, %p953_p0 }
   0xd   :  { %963 = shalt.err (!%p960_p4)
}
   0xe   :  { %s1096_s26 = smov 64   ;;  %s1097_s27 = smov 4  }
   0xf   :  { %39 = dma.hbm_to_vmem [thread:$0]  %s1256_s1, 2048, %s34_s22, [#allocation7], %s1096_s26, %s1096_s26, %s1097_s27  }
  0x10   :  { %s972_s30 = scalar_lea.vmem %s56_s24, 2048  ;;  %p977_p6 = scmp.lt.s32.totalorder %s56_s24, %s56_s24 }
  0x11   :  { %p973_p5 = scmp.ne.s32.totalorder %s56_s24, %s972_s30  ;;  %p978_p7 = scmp.lt.s32.totalorder %s972_s30, %s972_s30 }
  0x13   :  { %p979_p8 = por %p978_p7, %p977_p6 }
  0x15   :  { %p980_p9 = pnand %p979_p8, %p973_p5 }
  0x17   :  { %983 = shalt.err (!%p980_p9)
}
  0x18   :  { %s1098_s7 = smov 128   ;;  %s1099_s8 = smov 8  }
  0x19   :  { %61 = dma.hbm_to_vmem [thread:$0]  %s1258_s3, 2048, %s56_s24, [#allocation10], %s1098_s7, %s1098_s7, %s1099_s8  }
  0x1a   :  { %s1100_s11 = smov [#allocation3]   ;;  %s1101_s13 = smov [#allocation8]  }
  0x1b   :  { %s21_s12 = sshll.u32 %s1100_s11, 4  ;;  %s46_s1 = sshll.u32 %s1101_s13, 4  ;;  %s22_s12 = int_to_ptr.vmem [resolvable:$true] %s21_s12  ;;  %s47_s1 = int_to_ptr.vmem [resolvable:$true] %s46_s1 }
  0x1c   :  { %s992_s14 = scalar_lea.vmem %s22_s12, 128  ;;  %p997_p11 = scmp.lt.s32.totalorder %s22_s12, %s22_s12 }
  0x1d   :  { %p993_p10 = scmp.ne.s32.totalorder %s22_s12, %s992_s14  ;;  %p998_p12 = scmp.lt.s32.totalorder %s992_s14, %s992_s14 }
  0x1f   :  { %p999_p13 = por %p998_p12, %p997_p11 }
  0x21   :  { %p1000_p0 = pnand %p999_p13, %p993_p10 }
  0x23   :  { %1003 = shalt.err (!%p1000_p0)
}
  0x24   :  { %27 = dma.hbm_to_vmem [thread:$0]  %s1255_s0, 128, %s22_s12, [#allocation4], %s1096_s26, %s1096_s26, %s1097_s27  }
  0x25   :  { %s1012_s17 = scalar_lea.vmem %s47_s1, 128  ;;  %p1017_p2 = scmp.lt.s32.totalorder %s47_s1, %s47_s1 }
  0x26   :  { %p1013_p1 = scmp.ne.s32.totalorder %s47_s1, %s1012_s17  ;;  %p1018_p3 = scmp.lt.s32.totalorder %s1012_s17, %s1012_s17 }
  0x28   :  { %p1019_p4 = por %p1018_p3, %p1017_p2 }
  0x2a   :  { %p1020_p5 = pnand %p1019_p4, %p1013_p1 }
  0x2c   :  { %1023 = shalt.err (!%p1020_p5)
}
  0x2d   :  { %49 = dma.hbm_to_vmem [thread:$0]  %s1257_s2, 128, %s47_s1, [#allocation7]  }
  0x2e   :  { %s1102_s19 = smov [#allocation11]   ;;  %s1103_s21 = smov [#allocation12]  }
  0x2f   :  { %s67_s20 = sshll.u32 %s1102_s19, 4  ;;  %s79_s22 = sshll.u32 %s1103_s21, 4  ;;  %s68_s20 = int_to_ptr.vmem [resolvable:$true] %s67_s20  ;;  %s80_s22 = int_to_ptr.vmem [resolvable:$true] %s79_s22 }
  0x30   :  { %s1032_s23 = scalar_lea.vmem %s68_s20, 2048  ;;  %p1037_p7 = scmp.lt.s32.totalorder %s68_s20, %s68_s20 }
  0x31   :  { %p1033_p6 = scmp.ne.s32.totalorder %s68_s20, %s1032_s23  ;;  %p1038_p8 = scmp.lt.s32.totalorder %s1032_s23, %s1032_s23 }
  0x33   :  { %p1039_p9 = por %p1038_p8, %p1037_p7 }
  0x35   :  { %p1040_p10 = pnand %p1039_p9, %p1033_p6 }
  0x37   :  { %1043 = shalt.err (!%p1040_p10)
}
  0x38   :  { %73 = dma.hbm_to_vmem [thread:$0]  %s1259_s4, 2048, %s68_s20, [#allocation10], %s1098_s7, %s1098_s7, %s1099_s8  }
  0x39   :  { %s1052_s2 = scalar_lea.vmem %s80_s22, 2048  ;;  %p1057_p12 = scmp.lt.s32.totalorder %s80_s22, %s80_s22 }
  0x3a   :  { %p1053_p11 = scmp.ne.s32.totalorder %s80_s22, %s1052_s2  ;;  %p1058_p13 = scmp.lt.s32.totalorder %s1052_s2, %s1052_s2 }
  0x3c   :  { %p1059_p0 = por %p1058_p13, %p1057_p12 }
  0x3e   :  { %p1060_p1 = pnand %p1059_p0, %p1053_p11 }
  0x40   :  { %1063 = shalt.err (!%p1060_p1)
}
  0x41   :  { %85 = dma.hbm_to_vmem [thread:$0]  %s1260_s5, 2048, %s80_s22, [#allocation13], %s1098_s7, %s1098_s7, %s1099_s8  }
  0x42   :  { %1084 = dma.done.wait [#allocation4], 128  }
  0x43   :  { %1085 = vsyncadd [#allocation4], 4294967168 }
  0x44   :  { %1086 = dma.done.wait [#allocation7], 2176  }
  0x45   :  { %1087 = vsyncadd [#allocation7], 4294965120 }
  0x46   :  { %1088 = dma.done.wait [#allocation10], 4096  }
  0x47   :  { %1089 = vsyncadd [#allocation10], 4294963200 }
  0x48   :  { %1090 = dma.done.wait [#allocation13], 2048  }
  0x49   :  { %1091 = vsyncadd [#allocation13], 4294965248  ;;  %v1104_v0 = vmov 0.0   ;;  %vm1105_vm0 = vmmov 0   ;;  %v920_v1 = vld [vmem:[#allocation6 + $0x38] sm:$0xff]   ;;  %v922_v3 = vld [vmem:[#allocation6 + $0x30] sm:$0xff]   ;;  %v349_v36 = vlaneseq }
  0x4a   :  { %762 = vmatprep.subr.bf16.mxu0 %v1104_v0  ;;  %109 = vst [vmem:[#allocation2] sm:$0xf] %v1104_v0  ;;  %782 = vmatprep.subr.bf16.mxu1 %v1104_v0  ;;  %v921_v2 = vld [vmem:[#allocation6 + $0x78] sm:$0xff]   ;;  %v923_v4 = vld [vmem:[#allocation6 + $0x70] sm:$0xff]   ;;  %v924_v5 = vld [vmem:[#allocation6 + $0x28] sm:$0xff]   ;;  %vm343_vm1 = vcmask 1043456  }
  0x4b   :  { %778 = vmatprep.mubr.msk.bf16.mxu0 %vm1105_vm0, %v1104_v0  ;;  %798 = vmatprep.mubr.msk.bf16.mxu1 %vm1105_vm0, %v1104_v0  ;;  %v925_v6 = vld [vmem:[#allocation6 + $0x68] sm:$0xff]   ;;  %v926_v7 = vld [vmem:[#allocation6 + $0x20] sm:$0xff]   ;;  %v928_v9 = vld [vmem:[#allocation6 + $0x18] sm:$0xff]   ;;  %v1196_v37 = vand.u32 127, %v349_v36  ;;  %s1106_s4 = smov [#allocation14]  }
  0x4c   :  { %763 = vmatpush3.bf16.msra.mxu0 %v920_v1  ;;  %783 = vmatpush3.bf16.msra.mxu1 %v921_v2  ;;  %v927_v8 = vld [vmem:[#allocation6 + $0x60] sm:$0xff]   ;;  %v929_v10 = vld [vmem:[#allocation6 + $0x58] sm:$0xff]   ;;  %v930_v11 = vld [vmem:[#allocation6 + $0x10] sm:$0xff]   ;;  %s659_s5 = sshll.u32 %s1106_s4, 4  ;;  %s660_s5 = int_to_ptr.vmem [resolvable:$true] %s659_s5 }
  0x4d   :  { %764 = vmatprep.subr.bf16.mxu0 %v1104_v0  ;;  %784 = vmatprep.subr.bf16.mxu1 %v1104_v0  ;;  %v931_v12 = vld [vmem:[#allocation6 + $0x50] sm:$0xff]   ;;  %v932_v13 = vld [vmem:[#allocation6 + $0x8] sm:$0xff]   ;;  %v934_v15 = vld [vmem:[#allocation6] sm:$0xff]   ;;  %vm351_vm2 = vcmp.lt.s32.totalorder %v1196_v37, 32  ;;  %vm650_vm3 = vcmp.lt.s32.totalorder %v1196_v37, 4  ;;  %s1064_s27 = scalar_lea.vmem %s660_s5, 64  ;;  %p1069_p3 = scmp.lt.s32.totalorder %s660_s5, %s660_s5 }
  0x4e   :  { %v933_v14 = vld [vmem:[#allocation6 + $0x48] sm:$0xff]   ;;  %v111_v16 = vld [vmem:[#allocation3] sm:$0xf]  ;;  %v935_v17 = vld [vmem:[#allocation6 + $0x40] sm:$0xff]   ;;  %p1065_p2 = scmp.ne.s32.totalorder %s660_s5, %s1064_s27  ;;  %p1070_p4 = scmp.lt.s32.totalorder %s1064_s27, %s1064_s27 }
  0x4f   :  { %v219_v18 = vld [vmem:[#allocation3 + $0x4] sm:$0xf]  ;;  %v112_v19 = vpack.c.bf16 %v111_v16, %v111_v16  ;;  %v687_v32 = vld [vmem:[#allocation8] ss:$0 sm:$0xff]  ;;  %v385_v46 = vld [vmem:[#allocation9 + $0x68] sm:$0xff] }
  0x50   :  { %765 = vmatpush3.bf16.msra.mxu0 %v922_v3  ;;  %785 = vmatpush3.bf16.msra.mxu1 %v923_v4  ;;  %v220_v20 = vpack.c.bf16 %v219_v18, %v219_v18  ;;  %v387_v44 = vld [vmem:[#allocation9 + $0x78] sm:$0xff]  ;;  %v386_v45 = vld [vmem:[#allocation9 + $0x70] sm:$0xff]  ;;  %v384_v47 = vld [vmem:[#allocation9 + $0x60] sm:$0xff]  ;;  %p1071_p5 = por %p1070_p4, %p1069_p3 }
  0x51   :  { %766 = vmatprep.subr.bf16.mxu0 %v1104_v0  ;;  %786 = vmatprep.subr.bf16.mxu1 %v1104_v0  ;;  %v110_v21 = vld [vmem:[#allocation2] sm:$0xf]  ;;  %v383_v48 = vld [vmem:[#allocation9 + $0x58] sm:$0xff]  ;;  %v382_v49 = vld [vmem:[#allocation9 + $0x50] sm:$0xff] }
  0x52   :  { %v381_v50 = vld [vmem:[#allocation9 + $0x48] sm:$0xff]  ;;  %v380_v51 = vld [vmem:[#allocation9 + $0x40] sm:$0xff]  ;;  %v379_v52 = vld [vmem:[#allocation9 + $0x38] sm:$0xff]  ;;  %p1072_p6 = pnand %p1071_p5, %p1065_p2 }
  0x53   :  { %v378_v53 = vld [vmem:[#allocation9 + $0x30] sm:$0xff]  ;;  %v377_v54 = vld [vmem:[#allocation9 + $0x28] sm:$0xff]  ;;  %v376_v55 = vld [vmem:[#allocation9 + $0x20] sm:$0xff] }
  0x54   :  { %767 = vmatpush3.bf16.msra.mxu0 %v924_v5  ;;  %787 = vmatpush3.bf16.msra.mxu1 %v925_v6  ;;  %v375_v56 = vld [vmem:[#allocation9 + $0x18] sm:$0xff]  ;;  %v374_v57 = vld [vmem:[#allocation9 + $0x10] sm:$0xff]  ;;  %v373_v58 = vld [vmem:[#allocation9 + $0x8] sm:$0xff] }
  0x55   :  { %768 = vmatprep.subr.bf16.mxu0 %v1104_v0  ;;  %788 = vmatprep.subr.bf16.mxu1 %v1104_v0  ;;  %v372_v59 = vld [vmem:[#allocation9] sm:$0xff]  ;;  %v478_v60 = vld [vmem:[#allocation11 + $0x78] sm:$0xff]  ;;  %v477_v61 = vld [vmem:[#allocation11 + $0x70] sm:$0xff] }
  0x56   :  { %v476_v62 = vld [vmem:[#allocation11 + $0x68] sm:$0xff]  ;;  %v475_v63 = vld [vmem:[#allocation11 + $0x60] sm:$0xff]  ;;  %v474_v1 = vld [vmem:[#allocation11 + $0x58] sm:$0xff] }
  0x57   :  { %v473_v2 = vld [vmem:[#allocation11 + $0x50] sm:$0xff]  ;;  %v472_v3 = vld [vmem:[#allocation11 + $0x48] sm:$0xff]  ;;  %v471_v4 = vld [vmem:[#allocation11 + $0x40] sm:$0xff] }
  0x58   :  { %769 = vmatpush3.bf16.msra.mxu0 %v926_v7  ;;  %789 = vmatpush3.bf16.msra.mxu1 %v927_v8  ;;  %v470_v5 = vld [vmem:[#allocation11 + $0x38] sm:$0xff]  ;;  %v469_v6 = vld [vmem:[#allocation11 + $0x30] sm:$0xff]  ;;  %v468_v7 = vld [vmem:[#allocation11 + $0x28] sm:$0xff] }
  0x59   :  { %770 = vmatprep.subr.bf16.mxu0 %v1104_v0  ;;  %790 = vmatprep.subr.bf16.mxu1 %v1104_v0  ;;  %v467_v8 = vld [vmem:[#allocation11 + $0x20] sm:$0xff]  ;;  %v689_v16 = vld [vmem:[#allocation8 + $0x2] ss:$0 sm:$0xff]  ;;  %v690_v36 = vld [vmem:[#allocation8 + $0x3] ss:$0 sm:$0xff] }
  0x5c   :  { %771 = vmatpush3.bf16.msra.mxu0 %v928_v9  ;;  %791 = vmatpush3.bf16.msra.mxu1 %v929_v10  ;;  %v466_v9 = vld [vmem:[#allocation11 + $0x18] sm:$0xff] }
  0x5d   :  { %772 = vmatprep.subr.bf16.mxu0 %v1104_v0  ;;  %792 = vmatprep.subr.bf16.mxu1 %v1104_v0 }
  0x60   :  { %773 = vmatpush3.bf16.msra.mxu0 %v930_v11  ;;  %793 = vmatpush3.bf16.msra.mxu1 %v931_v12 }
  0x61   :  { %774 = vmatprep.subr.bf16.mxu0 %v1104_v0  ;;  %794 = vmatprep.subr.bf16.mxu1 %v1104_v0 }
  0x64   :  { %775 = vmatpush3.bf16.msra.mxu0 %v932_v13  ;;  %795 = vmatpush3.bf16.msra.mxu1 %v933_v14  ;;  %v688_v14 = vld [vmem:[#allocation8 + $0x1] ss:$0 sm:$0xff] }
  0x65   :  { %776 = vmatprep.subr.bf16.mxu0 %v1104_v0  ;;  %796 = vmatprep.subr.bf16.mxu1 %v1104_v0 }
  0x68   :  { %777 = vmatpush3.bf16.msra.mxu0 %v934_v15  ;;  %797 = vmatpush3.bf16.msra.mxu1 %v935_v17 }
  0x69   :  { %802 = vmatprep.subr.mxu0 %v1104_v0  ;;  %837 = vmatprep.subr.mxu1 %v1104_v0 }
  0x6b   :  { %779 = vmatmul.mubr.bf16.vlgmr.msra.gmra.mxu0 %v112_v19  ;;  %799 = vmatmul.mubr.bf16.vlgmr.msra.gmra.mxu1 %v220_v20  ;;  %v465_v20 = vld [vmem:[#allocation11 + $0x10] sm:$0xff] }
  0x6c   :  { %834 = vmatprep.mubr.msk.f32.mxu0 %vm1105_vm0, %v1104_v0  ;;  %869 = vmatprep.mubr.msk.f32.mxu1 %vm1105_vm0, %v1104_v0 }
  0x6d   :  { %803 = vmatpush3.msra.mxu0 %v387_v44  ;;  %838 = vmatpush3.msra.mxu1 %v478_v60  ;;  %v554_v44 = vld [vmem:[#allocation12] sm:$0xff] }
  0x6e   :  { %804 = vmatprep.subr.mxu0 %v1104_v0  ;;  %839 = vmatprep.subr.mxu1 %v1104_v0 }
  0x6f   :  { %805 = vmatpush3.msra.mxu0 %v386_v45  ;;  %840 = vmatpush3.msra.mxu1 %v477_v61  ;;  %v691_v45 = vld [vmem:[#allocation8 + $0x4] ss:$0 sm:$0xff] }
  0x70   :  { %806 = vmatprep.subr.mxu0 %v1104_v0  ;;  %841 = vmatprep.subr.mxu1 %v1104_v0 }
  0x71   :  { %807 = vmatpush3.msra.mxu0 %v385_v46  ;;  %842 = vmatpush3.msra.mxu1 %v476_v62 }
  0x72   :  { %808 = vmatprep.subr.mxu0 %v1104_v0  ;;  %843 = vmatprep.subr.mxu1 %v1104_v0 }
  0x73   :  { %809 = vmatpush3.msra.mxu0 %v384_v47  ;;  %844 = vmatpush3.msra.mxu1 %v475_v63 }
  0x74   :  { %810 = vmatprep.subr.mxu0 %v1104_v0  ;;  %845 = vmatprep.subr.mxu1 %v1104_v0 }
  0x75   :  { %811 = vmatpush3.msra.mxu0 %v383_v48  ;;  %846 = vmatpush3.msra.mxu1 %v474_v1 }
  0x76   :  { %812 = vmatprep.subr.mxu0 %v1104_v0  ;;  %847 = vmatprep.subr.mxu1 %v1104_v0 }
  0x77   :  { %813 = vmatpush3.msra.mxu0 %v382_v49  ;;  %848 = vmatpush3.msra.mxu1 %v473_v2 }
  0x78   :  { %814 = vmatprep.subr.mxu0 %v1104_v0  ;;  %849 = vmatprep.subr.mxu1 %v1104_v0 }
  0x79   :  { %815 = vmatpush3.msra.mxu0 %v381_v50  ;;  %850 = vmatpush3.msra.mxu1 %v472_v3  ;;  %v692_v50 = vld [vmem:[#allocation8 + $0x5] ss:$0 sm:$0xff] }
  0x7a   :  { %816 = vmatprep.subr.mxu0 %v1104_v0  ;;  %851 = vmatprep.subr.mxu1 %v1104_v0 }
  0x7b   :  { %817 = vmatpush3.msra.mxu0 %v380_v51  ;;  %852 = vmatpush3.msra.mxu1 %v471_v4 }
  0x7c   :  { %818 = vmatprep.subr.mxu0 %v1104_v0  ;;  %853 = vmatprep.subr.mxu1 %v1104_v0 }
  0x7d   :  { %819 = vmatpush3.msra.mxu0 %v379_v52  ;;  %854 = vmatpush3.msra.mxu1 %v470_v5 }
  0x7e   :  { %820 = vmatprep.subr.mxu0 %v1104_v0  ;;  %855 = vmatprep.subr.mxu1 %v1104_v0 }
  0x7f   :  { %821 = vmatpush3.msra.mxu0 %v378_v53  ;;  %856 = vmatpush3.msra.mxu1 %v469_v6 }
  0x80   :  { %822 = vmatprep.subr.mxu0 %v1104_v0  ;;  %857 = vmatprep.subr.mxu1 %v1104_v0 }
  0x81   :  { %823 = vmatpush3.msra.mxu0 %v377_v54  ;;  %858 = vmatpush3.msra.mxu1 %v468_v7 }
  0x82   :  { %824 = vmatprep.subr.mxu0 %v1104_v0  ;;  %859 = vmatprep.subr.mxu1 %v1104_v0 }
  0x83   :  { %825 = vmatpush3.msra.mxu0 %v376_v55  ;;  %860 = vmatpush3.msra.mxu1 %v467_v8 }
  0x84   :  { %826 = vmatprep.subr.mxu0 %v1104_v0  ;;  %861 = vmatprep.subr.mxu1 %v1104_v0 }
  0x85   :  { %827 = vmatpush3.msra.mxu0 %v375_v56  ;;  %862 = vmatpush3.msra.mxu1 %v466_v9 }
  0x86   :  { %828 = vmatprep.subr.mxu0 %v1104_v0  ;;  %863 = vmatprep.subr.mxu1 %v1104_v0 }
  0x87   :  { %829 = vmatpush3.msra.mxu0 %v374_v57  ;;  %864 = vmatpush3.msra.mxu1 %v465_v20 }
  0x88   :  { %830 = vmatprep.subr.mxu0 %v1104_v0  ;;  %865 = vmatprep.subr.mxu1 %v1104_v0 }
  0x89   :  { %831 = vmatpush3.msra.mxu0 %v373_v58 }
  0x8a   :  { %832 = vmatprep.subr.mxu0 %v1104_v0 }
  0x8b   :  { %833 = vmatpush3.msra.mxu0 %v372_v59 }
  0x8c   :  { %872 = vmatprep.subr.mxu0 %v1104_v0 }
 0x12b   :  { %v211_v22 = vpop.f32.mrf.mxu0  ;;  %v320_v24 = vpop.f32.mrf.mxu1 }
 0x12c   :  { %v217_v23 = vadd.f32 %v211_v22, %v110_v21  ;;  %v464_v21 = vld [vmem:[#allocation11 + $0x8] sm:$0xff]  ;;  %v463_v22 = vld [vmem:[#allocation11] sm:$0xff] }
 0x12d   :  { %v780_v25 = vpop.f32.mrf.mxu0  ;;  %v800_v27 = vpop.f32.mrf.mxu1  ;;  %866 = vmatpush3.msra.mxu1 %v464_v21 }
 0x12e   :  { %v326_v26 = vadd.f32 %v320_v24, %v217_v23  ;;  %867 = vmatprep.subr.mxu1 %v1104_v0  ;;  %v569_v23 = vld [vmem:[#allocation12 + $0x78] sm:$0xff]  ;;  %v568_v24 = vld [vmem:[#allocation12 + $0x70] sm:$0xff]  ;;  %v567_v25 = vld [vmem:[#allocation12 + $0x68] sm:$0xff] }
 0x12f   :  { %v214_v28 = vpop.f32.mrf.mxu0  ;;  %v323_v29 = vpop.f32.mrf.mxu1  ;;  %868 = vmatpush3.msra.mxu1 %v463_v22  ;;  %v565_v27 = vld [vmem:[#allocation12 + $0x58] sm:$0xff] }
 0x130   :  { %327 = vst [vmem:[#allocation2] sm:$0xf] %v326_v26  ;;  %v566_v26 = vld [vmem:[#allocation12 + $0x60] sm:$0xff]  ;;  %v564_v28 = vld [vmem:[#allocation12 + $0x50] sm:$0xff]  ;;  %v563_v29 = vld [vmem:[#allocation12 + $0x48] sm:$0xff] }
 0x131   :  { %v781_v30 = vpop.f32.mrf.mxu0  ;;  %v801_v31 = vpop.f32.mrf.mxu1 }
 0x132   :  { %v562_v30 = vld [vmem:[#allocation12 + $0x40] sm:$0xff]  ;;  %v561_v31 = vld [vmem:[#allocation12 + $0x38] sm:$0xff] }
 0x137   :  { %v337_v33 = vld [vmem:[#allocation2] sm:$0xf] }
 0x138   :  { %v342_v34 = vadd.f32 %v687_v32, %v337_v33  ;;  %v560_v32 = vld [vmem:[#allocation12 + $0x30] sm:$0xff]  ;;  %v559_v33 = vld [vmem:[#allocation12 + $0x28] sm:$0xff] }
 0x13a   :  { %v344_v35 = vsel %vm343_vm1, %v342_v34, 0.0 }
 0x13b   :  { %345 = vadd.xlane.f32.xlu0 %v344_v35  ;;  %v557_v35 = vld [vmem:[#allocation12 + $0x18] sm:$0xff] }
 0x1c4   :  { %v346_v38 = vpop.xlane.xlu0 %345 }
 0x1c5   :  { %v347_v39 = vmul.f32 0.03125, %v346_v38 }
 0x1c7   :  { %v1199_v40 = vsub.f32 %v342_v34, %v347_v39  ;;  %v558_v34 = vld [vmem:[#allocation12 + $0x20] sm:$0xff] }
 0x1c9   :  { %v352_v41 = vsel %vm351_vm2, %v1199_v40, 0.0 }
 0x1ca   :  { %v353_v42 = vmul.f32 %v352_v41, %v352_v41 }
 0x1cc   :  { %v354_v43 = vsel %vm343_vm1, %v353_v42, 0.0  ;;  %v556_v42 = vld [vmem:[#allocation12 + $0x10] sm:$0xff] }
 0x1cd   :  { %355 = vadd.xlane.f32.xlu0 %v354_v43  ;;  %v555_v43 = vld [vmem:[#allocation12 + $0x8] sm:$0xff] }
 0x256   :  { %v356_v10 = vpop.xlane.xlu0 %355 }
 0x257   :  { %v357_v11 = vmul.f32 0.03125, %v356_v10 }
 0x259   :  { %v358_v12 = vadd.f32 1e-05, %v357_v11 }
 0x25b   :  { %936 = vrsqrt.f32 %v358_v12 }
 0x268   :  { %v937_v13 = vpop.eup %936 }
 0x269   :  { %v360_v15 = vmul.f32 %v937_v13, %v1199_v40 }
 0x26b   :  { %v365_v17 = vmul.f32 %v688_v14, %v360_v15 }
 0x26d   :  { %v370_v18 = vadd.f32 %v689_v16, %v365_v17 }
 0x26f   :  { %938 = vtanh.f32 %v370_v18 }
 0x27c   :  { %v939_v19 = vpop.eup %938 }
 0x27d   :  { %835 = vmatmul.mubr.f32.vlgmr.msra.gmra.mxu0 %v939_v19 }
 0x27e   :  { %904 = vmatprep.mubr.msk.f32.mxu0 %vm1105_vm0, %v1104_v0  ;;  %873 = vmatpush3.msra.mxu0 %v569_v23 }
 0x27f   :  { %874 = vmatprep.subr.mxu0 %v1104_v0 }
 0x280   :  { %875 = vmatpush3.msra.mxu0 %v568_v24 }
 0x281   :  { %876 = vmatprep.subr.mxu0 %v1104_v0 }
 0x282   :  { %877 = vmatpush3.msra.mxu0 %v567_v25 }
 0x283   :  { %878 = vmatprep.subr.mxu0 %v1104_v0 }
 0x284   :  { %879 = vmatpush3.msra.mxu0 %v566_v26 }
 0x285   :  { %880 = vmatprep.subr.mxu0 %v1104_v0 }
 0x286   :  { %881 = vmatpush3.msra.mxu0 %v565_v27 }
 0x287   :  { %882 = vmatprep.subr.mxu0 %v1104_v0 }
 0x288   :  { %883 = vmatpush3.msra.mxu0 %v564_v28 }
 0x289   :  { %884 = vmatprep.subr.mxu0 %v1104_v0 }
 0x28a   :  { %885 = vmatpush3.msra.mxu0 %v563_v29 }
 0x28b   :  { %886 = vmatprep.subr.mxu0 %v1104_v0 }
 0x28c   :  { %887 = vmatpush3.msra.mxu0 %v562_v30 }
 0x28d   :  { %888 = vmatprep.subr.mxu0 %v1104_v0 }
 0x28e   :  { %889 = vmatpush3.msra.mxu0 %v561_v31 }
 0x28f   :  { %890 = vmatprep.subr.mxu0 %v1104_v0 }
 0x290   :  { %891 = vmatpush3.msra.mxu0 %v560_v32 }
 0x291   :  { %892 = vmatprep.subr.mxu0 %v1104_v0 }
 0x292   :  { %893 = vmatpush3.msra.mxu0 %v559_v33 }
 0x293   :  { %894 = vmatprep.subr.mxu0 %v1104_v0 }
 0x294   :  { %895 = vmatpush3.msra.mxu0 %v558_v34 }
 0x295   :  { %896 = vmatprep.subr.mxu0 %v1104_v0 }
 0x296   :  { %897 = vmatpush3.msra.mxu0 %v557_v35 }
 0x297   :  { %898 = vmatprep.subr.mxu0 %v1104_v0 }
 0x298   :  { %899 = vmatpush3.msra.mxu0 %v556_v42 }
 0x299   :  { %900 = vmatprep.subr.mxu0 %v1104_v0 }
 0x29a   :  { %901 = vmatpush3.msra.mxu0 %v555_v43 }
 0x29b   :  { %902 = vmatprep.subr.mxu0 %v1104_v0 }
 0x29c   :  { %903 = vmatpush3.msra.mxu0 %v554_v44 }
 0x33d   :  { %v458_v38 = vpop.f32.mrf.mxu0 }
 0x33e   :  { %v459_v39 = vadd.f32 %v690_v36, %v458_v38 }
 0x33f   :  { %v836_v40 = vpop.f32.mrf.mxu0 }
 0x340   :  { %v462_v41 = vmax.f32 %v459_v39, 0.0 }
 0x342   :  { %870 = vmatmul.mubr.f32.vlgmr.msra.gmra.mxu1 %v462_v41 }
 0x402   :  { %v549_v46 = vpop.f32.mrf.mxu1 }
 0x403   :  { %v550_v47 = vadd.f32 %v691_v45, %v549_v46 }
 0x404   :  { %v871_v48 = vpop.f32.mrf.mxu1 }
 0x405   :  { %v553_v49 = vmax.f32 %v550_v47, 0.0 }
 0x407   :  { %905 = vmatmul.mubr.f32.vlgmr.msra.gmra.mxu0 %v553_v49 }
 0x4c7   :  { %v640_v51 = vpop.f32.mrf.mxu0 }
 0x4c8   :  { %v641_v52 = vadd.f32 %v692_v50, %v640_v51 }
 0x4c9   :  { %v906_v53 = vpop.f32.mrf.mxu0 }
 0x4ca   :  { %940 = vtanh.f32 %v641_v52 }
 0x4d7   :  { %v941_v54 = vpop.eup %940 }
 0x4d8   :  { %v645_v55 = vadd.f32 1.0, %v941_v54 }
 0x4da   :  { %v646_v56 = vmul.f32 6.0, %v645_v55 }
 0x4dc   :  { %v647_v57 = vadd.f32 -10.0, %v646_v56 }
 0x4de   :  { %v648_v58 = vmul.f32 1.442695, %v647_v57 }
 0x4e0   :  { %942 = vpow2.f32 %v648_v58 }
 0x4ed   :  { %v943_v0 = vpop.eup %942 }
 0x4ee   :  { %v651_v59 = vsel %vm650_vm3, %v941_v54, %v943_v0 }
 0x4ef   :  { %652 = vst [vmem:[#allocation14] sm:$0xf] %v651_v59 }
 0x4f0   :  { %1075 = shalt.err (!%p1072_p6)
}
 0x4f1   :  { %662 = dma.vmem_to_hbm [thread:$0]  %s660_s5, 64, %s1261_s6, [#allocation5]  }
 0x4f2   :  { %1092 = dma.done.wait [#allocation5], 64  }
 0x4f3   :  { %1093 = vsyncadd [#allocation5], 4294967232 }
 0x4f4   :  { %666 = vsyncpa [#allocation4], 1 }
 0x4f5   :  { %667 = vsyncpa [#allocation7], 1 }
 0x4f6   :  { %668 = vsyncpa [#allocation10], 1 }
 0x4f7   :  { %669 = vsyncpa [#allocation13], 1 }
 0x4f8   :  { %670 = vsyncpa [#allocation5], 1 }

</bundles_post_ra>
